<compile_context>
chip_gen: v7x
topology: tpu7x:2x2x1
jax: 0.10.0
libtpu: 0.0.40
codegen_flags: <defaults>
</compile_context>

<pallas_src>
import jax
import jax.numpy as jnp
from jax.experimental import pallas as pl
from jax.experimental.pallas import tpu as pltpu


def _round_up(x, m):
    return ((x + m - 1) // m) * m


def _make_kernel(total_elems):
    # Python floats only -> inlined as literals, never captured constants.
    total_f = float(total_elems)
    inv_total = 1.0 / float(total_elems)

    def kernel(px_ref, py_ref, gx_ref, gy_ref, m_ref, area_ref, sig_ref,
               out_ref, acc_ref, cnt_ref):
        i = pl.program_id(0)

        @pl.when(i == 0)
        def _():
            acc_ref[...] = jnp.zeros_like(acc_ref)
            cnt_ref[...] = jnp.zeros_like(cnt_ref)

        px = px_ref[...]
        py = py_ref[...]
        gx = gx_ref[...]
        gy = gy_ref[...]
        m = m_ref[...]                       # (tile_n, K)
        area = area_ref[...]                 # (tile_n, 1)
        sig = sig_ref[...]                   # (1, K)

        dx = px - gx
        dy = py - gy
        d = dx * dx + dy * dy                # exact squares, no float pow

        two_sig = 2.0 * sig
        inv_sig2 = 0.5 / (two_sig * two_sig)     # (1, K):  1 / (2*sigmas)^2 / 2
        inv_area = 1.0 / (area + 1e-9)           # (tile_n, 1)
        e = d * inv_sig2 * inv_area              # broadcast to (tile_n, K)

        val = (1.0 - jnp.exp(-e)) * m            # single EUP op per element

        # Elementwise vector accumulation; reduce only once at the end.
        acc_ref[...] += val
        cnt_ref[...] += (m != 0.0).astype(jnp.float32)

        @pl.when(i == pl.num_programs(0) - 1)
        def _():
            loss_sum = jnp.sum(acc_ref[...])
            nonzero = jnp.sum(cnt_ref[...])
            # count(!=0) + count(==0) over the *original* (unpadded) mask.
            factor = total_f / (nonzero + 1e-9)
            out_ref[0, 0] = factor * loss_sum * inv_total

    return kernel


def keypoint_loss(pred_kpts, gt_kpts, kpt_mask, area, sigmas, *, tile_rows=512):
    """Pallas implementation of KeypointLoss.forward.

    pred_kpts, gt_kpts : (N, K, C) with x = [..., 0], y = [..., 1]
    kpt_mask           : (N, K)
    area               : (N, 1) or (N,)
    sigmas             : (K,)
    """
    N, K = kpt_mask.shape
    assert pred_kpts.shape[:2] == (N, K) and gt_kpts.shape[:2] == (N, K)
    total = N * K  # static -> count(!=0) + count(==0)

    px = pred_kpts[..., 0].astype(jnp.float32)
    py = pred_kpts[..., 1].astype(jnp.float32)
    gx = gt_kpts[..., 0].astype(jnp.float32)
    gy = gt_kpts[..., 1].astype(jnp.float32)
    m = kpt_mask.astype(jnp.float32)
    ar = area.reshape(N, 1).astype(jnp.float32)
    sg = sigmas.reshape(1, K).astype(jnp.float32)

    # Row tile: large for HBM efficiency, shrunk (and 8-aligned) for small N.
    tile_n = min(tile_rows, _round_up(N, 8))
    tile_n = _round_up(tile_n, 8)
    padded_n = _round_up(N, tile_n)
    if padded_n != N:
        pad = padded_n - N
        pad2 = lambda a: jnp.pad(a, ((0, pad), (0, 0)))
        px, py, gx, gy, m, ar = map(pad2, (px, py, gx, gy, m, ar))
        # padded rows: coords 0, mask 0, area 0 -> e = 0, (1-exp(0))*0 = 0.

    grid = (padded_n // tile_n,)
    kernel = _make_kernel(total)

    row_spec = pl.BlockSpec((tile_n, K), lambda i: (i, 0))

    out = pl.pallas_call(
        kernel,
        out_shape=jax.ShapeDtypeStruct((1, 1), jnp.float32),
        grid_spec=pltpu.PrefetchScalarGridSpec(
            num_scalar_prefetch=0,
            grid=grid,
            in_specs=[
                row_spec,                                        # pred x
                row_spec,                                        # pred y
                row_spec,                                        # gt x
                row_spec,                                        # gt y
                row_spec,                                        # mask
                pl.BlockSpec((tile_n, 1), lambda i: (i, 0)),     # area
                pl.BlockSpec((1, K), lambda i: (0, 0)),          # sigmas
            ],
            out_specs=pl.BlockSpec(memory_space=pltpu.MemorySpace.SMEM),
            scratch_shapes=[
                pltpu.VMEM((tile_n, K), jnp.float32),  # loss accumulator
                pltpu.VMEM((tile_n, K), jnp.float32),  # nonzero-mask accumulator
            ],
        ),
        compiler_params=pltpu.CompilerParams(
            dimension_semantics=("arbitrary",),  # sequential reduction into accumulators
        ),
    )(px, py, gx, gy, m, ar, sg)
    return out[0, 0]


def keypoint_loss_ref(pred_kpts, gt_kpts, kpt_mask, area, sigmas):
    # Pure-JAX reference mirroring the PyTorch forward exactly.
    d = (pred_kpts[..., 0] - gt_kpts[..., 0]) ** 2 + (pred_kpts[..., 1] - gt_kpts[..., 1]) ** 2
    kpt_loss_factor = (jnp.sum(kpt_mask != 0) + jnp.sum(kpt_mask == 0)) / (jnp.sum(kpt_mask != 0) + 1e-9)
    e = d / (2 * sigmas) ** 2 / (area + 1e-9) / 2
    return kpt_loss_factor * ((1 - jnp.exp(-e)) * kpt_mask).mean()


if __name__ == "__main__":
    key = jax.random.PRNGKey(0)
    k1, k2, k3, k4, k5 = jax.random.split(key, 5)

    # Small shapes implied by the forward: N matched instances, K=17 COCO keypoints.
    N, K = 64, 17
    pred_kpts = jax.random.normal(k1, (N, K, 3), dtype=jnp.float32) * 4.0
    gt_kpts = jax.random.normal(k2, (N, K, 3), dtype=jnp.float32) * 4.0
    kpt_mask = jax.random.bernoulli(k3, 0.7, (N, K)).astype(jnp.float32)
    area = jax.random.uniform(k4, (N, 1), dtype=jnp.float32, minval=1.0, maxval=100.0)
    sigmas = jax.random.uniform(k5, (K,), dtype=jnp.float32, minval=0.025, maxval=0.11)

    loss = keypoint_loss(pred_kpts, gt_kpts, kpt_mask, area, sigmas)
    loss = jax.block_until_ready(loss)

    ref = keypoint_loss_ref(pred_kpts, gt_kpts, kpt_mask, area, sigmas)
    assert jnp.allclose(loss, ref, rtol=1e-5, atol=1e-5), (loss, ref)

    print("KERNEL_OK")
</pallas_src>

<mosaic_0001>
module attributes {stable_mosaic.version = 11 : i64} {
  func.func @kernel(%arg0: i32, %arg1: memref<64x17xf32, #tpu.memory_space<vmem>>, %arg2: memref<64x17xf32, #tpu.memory_space<vmem>>, %arg3: memref<64x17xf32, #tpu.memory_space<vmem>>, %arg4: memref<64x17xf32, #tpu.memory_space<vmem>>, %arg5: memref<64x17xf32, #tpu.memory_space<vmem>>, %arg6: memref<64x1xf32, #tpu.memory_space<vmem>>, %arg7: memref<1x17xf32, #tpu.memory_space<vmem>>, %arg8: memref<1x1xf32, #tpu.memory_space<smem>>, %arg9: memref<64x17xf32, #tpu.memory_space<vmem>>, %arg10: memref<64x17xf32, #tpu.memory_space<vmem>>) attributes {dimension_semantics = [#tpu.dimension_semantics<arbitrary>], iteration_bounds = array<i64: 1>, scalar_prefetch = 0 : i64, scratch_operands = 2 : i64, tpu.core_type = #tpu.core_type<tc>, window_params = [{transform_indices = @transform_0, window_bounds = array<i64: 64, 17>}, {transform_indices = @transform_1, window_bounds = array<i64: 64, 17>}, {transform_indices = @transform_2, window_bounds = array<i64: 64, 17>}, {transform_indices = @transform_3, window_bounds = array<i64: 64, 17>}, {transform_indices = @transform_4, window_bounds = array<i64: 64, 17>}, {transform_indices = @transform_5, window_bounds = array<i64: 64, 1>}, {pipeline_mode = #tpu.pipeline_mode<synchronous>, transform_indices = @transform_6, window_bounds = array<i64: 1, 17>}, {transform_indices = @transform_7, window_bounds = array<i64: 1, 1>}]} {
    %c0_i32 = arith.constant 0 : i32
    %0 = arith.cmpi eq, %arg0, %c0_i32 : i32
    %1 = arith.extui %0 : i1 to i32
    %c0_i32_0 = arith.constant 0 : i32
    %2 = arith.cmpi ne, %1, %c0_i32_0 : i32
    scf.if %2 {
      %cst_30 = arith.constant 0.000000e+00 : f32
      %47 = vector.broadcast %cst_30 : f32 to vector<64x17xf32>
      %c0_31 = arith.constant 0 : index
      %c0_32 = arith.constant 0 : index
      %48 = vector.load %arg9[%c0_31, %c0_32] : memref<64x17xf32, #tpu.memory_space<vmem>>, vector<64x17xf32>
      tpu.vector_store %arg9[%c0_31, %c0_32], %47 {strides = array<i32>} : memref<64x17xf32, #tpu.memory_space<vmem>>, vector<64x17xf32>,
      %cst_33 = arith.constant 0.000000e+00 : f32
      %49 = vector.broadcast %cst_33 : f32 to vector<64x17xf32>
      %c0_34 = arith.constant 0 : index
      %c0_35 = arith.constant 0 : index
      %50 = vector.load %arg10[%c0_34, %c0_35] : memref<64x17xf32, #tpu.memory_space<vmem>>, vector<64x17xf32>
      tpu.vector_store %arg10[%c0_34, %c0_35], %49 {strides = array<i32>} : memref<64x17xf32, #tpu.memory_space<vmem>>, vector<64x17xf32>,
    } else {
    }
    %c0 = arith.constant 0 : index
    %c0_1 = arith.constant 0 : index
    %3 = vector.load %arg1[%c0, %c0_1] : memref<64x17xf32, #tpu.memory_space<vmem>>, vector<64x17xf32>
    %c0_2 = arith.constant 0 : index
    %c0_3 = arith.constant 0 : index
    %4 = vector.load %arg2[%c0_2, %c0_3] : memref<64x17xf32, #tpu.memory_space<vmem>>, vector<64x17xf32>
    %c0_4 = arith.constant 0 : index
    %c0_5 = arith.constant 0 : index
    %5 = vector.load %arg3[%c0_4, %c0_5] : memref<64x17xf32, #tpu.memory_space<vmem>>, vector<64x17xf32>
    %c0_6 = arith.constant 0 : index
    %c0_7 = arith.constant 0 : index
    %6 = vector.load %arg4[%c0_6, %c0_7] : memref<64x17xf32, #tpu.memory_space<vmem>>, vector<64x17xf32>
    %c0_8 = arith.constant 0 : index
    %c0_9 = arith.constant 0 : index
    %7 = vector.load %arg5[%c0_8, %c0_9] : memref<64x17xf32, #tpu.memory_space<vmem>>, vector<64x17xf32>
    %c0_10 = arith.constant 0 : index
    %c0_11 = arith.constant 0 : index
    %8 = vector.load %arg6[%c0_10, %c0_11] : memref<64x1xf32, #tpu.memory_space<vmem>>, vector<64x1xf32>
    %c0_12 = arith.constant 0 : index
    %c0_13 = arith.constant 0 : index
    %9 = vector.load %arg7[%c0_12, %c0_13] : memref<1x17xf32, #tpu.memory_space<vmem>>, vector<1x17xf32>
    %10 = arith.subf %3, %5 : vector<64x17xf32>
    %11 = arith.subf %4, %6 : vector<64x17xf32>
    %12 = arith.mulf %10, %10 : vector<64x17xf32>
    %13 = arith.mulf %11, %11 : vector<64x17xf32>
    %14 = arith.addf %12, %13 : vector<64x17xf32>
    %cst = arith.constant 2.000000e+00 : f32
    %15 = vector.broadcast %cst : f32 to vector<1x17xf32>
    %16 = arith.mulf %15, %9 : vector<1x17xf32>
    %17 = arith.mulf %16, %16 : vector<1x17xf32>
    %cst_14 = arith.constant 5.000000e-01 : f32
    %18 = vector.broadcast %cst_14 : f32 to vector<1x17xf32>
    %19 = arith.divf %18, %17 : vector<1x17xf32>
    %cst_15 = arith.constant 9.99999971E-10 : f32
    %20 = vector.broadcast %cst_15 : f32 to vector<64x1xf32>
    %21 = arith.addf %8, %20 : vector<64x1xf32>
    %cst_16 = arith.constant 1.000000e+00 : f32
    %22 = vector.broadcast %cst_16 : f32 to vector<64x1xf32>
    %23 = arith.divf %22, %21 : vector<64x1xf32>
    %24 = vector.broadcast %19 : vector<1x17xf32> to vector<64x17xf32>
    %25 = arith.mulf %14, %24 : vector<64x17xf32>
    %26 = vector.broadcast %23 : vector<64x1xf32> to vector<64x17xf32>
    %27 = arith.mulf %25, %26 : vector<64x17xf32>
    %cst_17 = arith.constant 0.000000e+00 : f32
    %28 = vector.broadcast %cst_17 : f32 to vector<64x17xf32>
    %29 = arith.subf %28, %27 : vector<64x17xf32>
    %30 = math.exp %29 : vector<64x17xf32>
    %cst_18 = arith.constant 1.000000e+00 : f32
    %31 = vector.broadcast %cst_18 : f32 to vector<64x17xf32>
    %32 = arith.subf %31, %30 : vector<64x17xf32>
    %33 = arith.mulf %32, %7 : vector<64x17xf32>
    %c0_19 = arith.constant 0 : index
    %c0_20 = arith.constant 0 : index
    %34 = vector.load %arg9[%c0_19, %c0_20] : memref<64x17xf32, #tpu.memory_space<vmem>>, vector<64x17xf32>
    %35 = arith.addf %34, %33 : vector<64x17xf32>
    %c0_21 = arith.constant 0 : index
    %c0_22 = arith.constant 0 : index
    %36 = vector.load %arg9[%c0_21, %c0_22] : memref<64x17xf32, #tpu.memory_space<vmem>>, vector<64x17xf32>
    tpu.vector_store %arg9[%c0_21, %c0_22], %35 {strides = array<i32>} : memref<64x17xf32, #tpu.memory_space<vmem>>, vector<64x17xf32>,
    %c0_23 = arith.constant 0 : index
    %c0_24 = arith.constant 0 : index
    %37 = vector.load %arg10[%c0_23, %c0_24] : memref<64x17xf32, #tpu.memory_space<vmem>>, vector<64x17xf32>
    %cst_25 = arith.constant 0.000000e+00 : f32
    %38 = vector.broadcast %cst_25 : f32 to vector<64x17xf32>
    %39 = arith.cmpf one, %7, %38 : vector<64x17xf32>
    %40 = arith.extui %39 : vector<64x17xi1> to vector<64x17xi32>
    %41 = arith.sitofp %40 : vector<64x17xi32> to vector<64x17xf32>
    %42 = arith.addf %37, %41 : vector<64x17xf32>
    %c0_26 = arith.constant 0 : index
    %c0_27 = arith.constant 0 : index
    %43 = vector.load %arg10[%c0_26, %c0_27] : memref<64x17xf32, #tpu.memory_space<vmem>>, vector<64x17xf32>
    tpu.vector_store %arg10[%c0_26, %c0_27], %42 {strides = array<i32>} : memref<64x17xf32, #tpu.memory_space<vmem>>, vector<64x17xf32>,
    %c0_i32_28 = arith.constant 0 : i32
    %44 = arith.cmpi eq, %arg0, %c0_i32_28 : i32
    %45 = arith.extui %44 : i1 to i32
    %c0_i32_29 = arith.constant 0 : i32
    %46 = arith.cmpi ne, %45, %c0_i32_29 : i32
    scf.if %46 {
      %c0_30 = arith.constant 0 : index
      %c0_31 = arith.constant 0 : index
      %47 = vector.load %arg9[%c0_30, %c0_31] : memref<64x17xf32, #tpu.memory_space<vmem>>, vector<64x17xf32>
      %48 = vector.shape_cast %47 : vector<64x17xf32> to vector<1x64x17xf32>
      %cst_32 = arith.constant dense<0.000000e+00> : vector<1xf32>
      %49 = vector.multi_reduction <add>, %48, %cst_32 [1, 2] : vector<1x64x17xf32> to vector<1xf32>
      %50 = vector.shape_cast %49 : vector<1xf32> to vector<1x1x1xf32>
      %51 = vector.extract %50[0, 0, 0] : f32 from vector<1x1x1xf32>
      %c0_33 = arith.constant 0 : index
      %c0_34 = arith.constant 0 : index
      %52 = vector.load %arg10[%c0_33, %c0_34] : memref<64x17xf32, #tpu.memory_space<vmem>>, vector<64x17xf32>
      %53 = vector.shape_cast %52 : vector<64x17xf32> to vector<1x64x17xf32>
      %cst_35 = arith.constant dense<0.000000e+00> : vector<1xf32>
      %54 = vector.multi_reduction <add>, %53, %cst_35 [1, 2] : vector<1x64x17xf32> to vector<1xf32>
      %55 = vector.shape_cast %54 : vector<1xf32> to vector<1x1x1xf32>
      %56 = vector.extract %55[0, 0, 0] : f32 from vector<1x1x1xf32>
      %cst_36 = arith.constant 9.99999971E-10 : f32
      %57 = arith.addf %56, %cst_36 : f32
      %cst_37 = arith.constant 1.088000e+03 : f32
      %58 = arith.divf %cst_37, %57 : f32
      %59 = arith.mulf %58, %51 : f32
      %cst_38 = arith.constant 9.1911765E-4 : f32
      %60 = arith.mulf %59, %cst_38 : f32
      %c0_39 = arith.constant 0 : index
      %c0_40 = arith.constant 0 : index
      %61 = memref.load %arg8[%c0_39, %c0_40] : memref<1x1xf32, #tpu.memory_space<smem>>
      memref.store %60, %arg8[%c0_39, %c0_40] : memref<1x1xf32, #tpu.memory_space<smem>>
    } else {
    }
    return
  }
  func.func @transform_0(%arg0: i32) -> (i32, i32) {
    %c0_i32 = arith.constant 0 : i32
    %c0_i32_0 = arith.constant 0 : i32
    return %arg0, %c0_i32 : i32, i32
  }
  func.func @transform_1(%arg0: i32) -> (i32, i32) {
    %c0_i32 = arith.constant 0 : i32
    %c0_i32_0 = arith.constant 0 : i32
    return %arg0, %c0_i32 : i32, i32
  }
  func.func @transform_2(%arg0: i32) -> (i32, i32) {
    %c0_i32 = arith.constant 0 : i32
    %c0_i32_0 = arith.constant 0 : i32
    return %arg0, %c0_i32 : i32, i32
  }
  func.func @transform_3(%arg0: i32) -> (i32, i32) {
    %c0_i32 = arith.constant 0 : i32
    %c0_i32_0 = arith.constant 0 : i32
    return %arg0, %c0_i32 : i32, i32
  }
  func.func @transform_4(%arg0: i32) -> (i32, i32) {
    %c0_i32 = arith.constant 0 : i32
    %c0_i32_0 = arith.constant 0 : i32
    return %arg0, %c0_i32 : i32, i32
  }
  func.func @transform_5(%arg0: i32) -> (i32, i32) {
    %c0_i32 = arith.constant 0 : i32
    %c0_i32_0 = arith.constant 0 : i32
    return %arg0, %c0_i32 : i32, i32
  }
  func.func @transform_6(%arg0: i32) -> (i32, i32) {
    %c0_i32 = arith.constant 0 : i32
    %c0_i32_0 = arith.constant 0 : i32
    %c0_i32_1 = arith.constant 0 : i32
    return %c0_i32, %c0_i32_0 : i32, i32
  }
  func.func @transform_7(%arg0: i32) -> (i32, i32) {
    %c0_i32 = arith.constant 0 : i32
    %c0_i32_0 = arith.constant 0 : i32
    %c0_i32_1 = arith.constant 0 : i32
    return %c0_i32, %c0_i32_0 : i32, i32
  }
}

</mosaic_0001>

<bundles_post_ra>
// kernel: tpu_custom_call.1
= control target key start
LH: loop header
LB: loop body
LE: loop exit
PB: predicated region body
PF: predicated region fallthrough
CT: control target
= control target key end

     0   :  { %v496_v3 = vmov 0   ;;  %s802_s0 = inlined_call_operand.vmem [shape: f32[64,17], index: 0, kind: input, shape index: {}]   ;;  %s803_s1 = inlined_call_operand.vmem [shape: f32[64,17], index: 1, kind: input, shape index: {}]   ;;  %s804_s2 = inlined_call_operand.vmem [shape: f32[64,17], index: 2, kind: input, shape index: {}]   ;;  %s805_s3 = inlined_call_operand.vmem [shape: f32[64,17], index: 3, kind: input, shape index: {}]   ;;  %s806_s4 = inlined_call_operand.vmem [shape: f32[64,17], index: 4, kind: input, shape index: {}]   ;;  %s807_s5 = inlined_call_operand.vmem [shape: f32[64,1], index: 5, kind: input, shape index: {}]   ;;  %s808_s6 = inlined_call_operand.vmem [shape: f32[1,17], index: 6, kind: input, shape index: {}]   ;;  %s809_s7 = inlined_call_operand.hbm [shape: f32[1,1], index: 7, kind: output, shape index: {}]  }
   0x1   :  { %v90_v0 = vld [vmem:[%s807_s5 + $0x10] sm:$0xff]  ;;  %v88_v1 = vld [vmem:[%s807_s5] sm:$0xff]  ;;  %v91_v2 = vld [vmem:[%s807_s5 + $0x18] sm:$0xff]  ;;  %447 = vset.pattern.permute.xlu1 %v496_v3  ;;  %446 = vset.pattern.permute.xlu0 %v496_v3 }
   0x2   :  { %v143_v4 = vadd.f32 1e-09, %v90_v0  ;;  %v141_v5 = vadd.f32 1e-09, %v88_v1  ;;  %v144_v6 = vadd.f32 1e-09, %v91_v2 }
   0x3   :  { %v89_v7 = vld [vmem:[%s807_s5 + $0x8] sm:$0xff]  ;;  %v92_v10 = vld [vmem:[%s807_s5 + $0x20] sm:$0xff]  ;;  %v95_v13 = vld [vmem:[%s807_s5 + $0x38] sm:$0xff] }
   0x4   :  { %v93_v8 = vld [vmem:[%s807_s5 + $0x28] sm:$0xff]  ;;  %448 = vrcp.f32 %v143_v4  ;;  %v142_v9 = vadd.f32 1e-09, %v89_v7  ;;  %v145_v12 = vadd.f32 1e-09, %v92_v10  ;;  %v94_v14 = vld [vmem:[%s807_s5 + $0x30] sm:$0xff] }
   0x5   :  { %450 = vrcp.f32 %v141_v5  ;;  %v146_v11 = vadd.f32 1e-09, %v93_v8 }
   0x6   :  { %452 = vrcp.f32 %v144_v6 }
   0x7   :  { %454 = vrcp.f32 %v142_v9 }
   0x8   :  { %12 = vsyncpa [#allocation5], 0  ;;  %456 = vrcp.f32 %v146_v11  ;;  %v148_v15 = vadd.f32 1e-09, %v95_v13  ;;  %v147_v16 = vadd.f32 1e-09, %v94_v14 }
   0x9   :  { %458 = vrcp.f32 %v145_v12  ;;  %vm31_vm0 = vcmask 138240   ;;  %v497_v19 = vmov 0.0   ;;  %v598_v26 = vld [vmem:[%s806_s4 + $0x10] sm:$0xff]  ;;  %v603_v27 = vld [vmem:[%s806_s4] sm:$0xff]  ;;  %v608_v28 = vld [vmem:[%s806_s4 + $0x8] sm:$0xff]  ;;  %s484_s25 = scalar_lea.hbm %s809_s7, 16 }
   0xa   :  { %460 = vrcp.f32 %v148_v15  ;;  %34 = vst.msk [vmem:[#allocation2 + $0x10] sm:$0xff] %vm31_vm0, %v497_v19  ;;  %42 = vst.msk [vmem:[#allocation3 + $0x10] sm:$0xff] %vm31_vm0, %v497_v19  ;;  %vm300_vm1 = vcmp.ne.f32.partialorder %v603_v27, 0.0  ;;  %vm301_vm2 = vcmp.ne.f32.partialorder %v608_v28, 0.0  ;;  %vm302_vm3 = vcmp.ne.f32.partialorder %v598_v26, 0.0  ;;  %v619_v37 = vld [vmem:[%s806_s4 + $0x18] sm:$0xff]  ;;  %p485_p0 = scmp.ne.s32.totalorder %s809_s7, %s484_s25  ;;  %p488_p1 = scmp.lt.u32.totalorder %s484_s25, %s809_s7 }
   0xb   :  { %462 = vrcp.f32 %v147_v16  ;;  %32 = vst.msk [vmem:[#allocation2] sm:$0xff] %vm31_vm0, %v497_v19  ;;  %33 = vst.msk [vmem:[#allocation2 + $0x8] sm:$0xff] %vm31_vm0, %v497_v19  ;;  %v429_v30 = vsel %vm300_vm1, 1.0, %v497_v19  ;;  %v430_v32 = vsel %vm301_vm2, 1.0, %v497_v19  ;;  %v431_v36 = vsel %vm302_vm3, 1.0, %v497_v19  ;;  %v628_v41 = vld [vmem:[%s806_s4 + $0x20] sm:$0xff] }
   0xc   :  { %35 = vst.msk [vmem:[#allocation2 + $0x18] sm:$0xff] %vm31_vm0, %v497_v19  ;;  %36 = vst.msk [vmem:[#allocation2 + $0x20] sm:$0xff] %vm31_vm0, %v497_v19  ;;  %vm303_vm4 = vcmp.ne.f32.partialorder %v619_v37, 0.0  ;;  %vm304_vm5 = vcmp.ne.f32.partialorder %v628_v41, 0.0  ;;  %v635_v43 = vld [vmem:[%s806_s4 + $0x28] sm:$0xff]  ;;  %v644_v49 = vld [vmem:[%s806_s4 + $0x30] sm:$0xff]  ;;  %p490_p2 = pnand %p488_p1, %p485_p0 }
   0xd   :  { %37 = vst.msk [vmem:[#allocation2 + $0x28] sm:$0xff] %vm31_vm0, %v497_v19  ;;  %38 = vst.msk [vmem:[#allocation2 + $0x30] sm:$0xff] %vm31_vm0, %v497_v19  ;;  %v432_v40 = vsel %vm303_vm4, 1.0, %v497_v19  ;;  %v433_v45 = vsel %vm304_vm5, 1.0, %v497_v19  ;;  %vm305_vm6 = vcmp.ne.f32.partialorder %v635_v43, 0.0  ;;  %vm306_vm7 = vcmp.ne.f32.partialorder %v644_v49, 0.0 }
   0xe   :  { %v449_v17 = vpop.eup %448  ;;  %39 = vst.msk [vmem:[#allocation2 + $0x38] sm:$0xff] %vm31_vm0, %v497_v19  ;;  %40 = vst.msk [vmem:[#allocation3] sm:$0xff] %vm31_vm0, %v497_v19  ;;  %v434_v48 = vsel %vm305_vm6, 1.0, %v497_v19  ;;  %v651_v51 = vld [vmem:[%s806_s4 + $0x38] sm:$0xff]  ;;  %v435_v53 = vsel %vm306_vm7, 1.0, %v497_v19 }
   0xf   :  { %v451_v18 = vpop.eup %450  ;;  %191 = vperm.xlu1 %447, %v449_v17   ;;  %41 = vst.msk [vmem:[#allocation3 + $0x8] sm:$0xff] %vm31_vm0, %v497_v19  ;;  %43 = vst.msk [vmem:[#allocation3 + $0x18] sm:$0xff] %vm31_vm0, %v497_v19  ;;  %vm307_vm8 = vcmp.ne.f32.partialorder %v651_v51, 0.0  ;;  %v96_v17 = vld [vmem:[%s808_s6] sm:$0x1] }
  0x10   :  { %44 = vst.msk [vmem:[#allocation3 + $0x20] sm:$0xff] %vm31_vm0, %v497_v19  ;;  %45 = vst.msk [vmem:[#allocation3 + $0x28] sm:$0xff] %vm31_vm0, %v497_v19  ;;  %v453_v20 = vpop.eup %452  ;;  %181 = vperm.xlu0 %446, %v451_v18   ;;  %v436_v58 = vsel %vm307_vm8, 1.0, %v497_v19  ;;  %v137_v18 = vmul.f32 2.0, %v96_v17 }
  0x11   :  { %46 = vst.msk [vmem:[#allocation3 + $0x30] sm:$0xff] %vm31_vm0, %v497_v19  ;;  %47 = vst.msk [vmem:[#allocation3 + $0x38] sm:$0xff] %vm31_vm0, %v497_v19  ;;  %v455_v21 = vpop.eup %454  ;;  %v294_v35 = vld [vmem:[#allocation3 + $0x10] sm:$0xff] }
  0x12   :  { %v457_v22 = vpop.eup %456  ;;  %v326_v38 = vadd.f32 %v431_v36, %v294_v35  ;;  %v138_v19 = vmul.f32 %v137_v18, %v137_v18  ;;  %v71_v18 = vld [vmem:[%s804_s2 + $0x38] sm:$0xff] }
  0x13   :  { %196 = vperm.xlu1 %447, %v453_v20   ;;  %v459_v23 = vpop.eup %458  ;;  %v166_v20 = vlaneseq }
  0x14   :  { %186 = vperm.xlu0 %446, %v455_v21   ;;  %v461_v24 = vpop.eup %460  ;;  %334 = vst.msk [vmem:[#allocation3 + $0x10] sm:$0xff] %vm31_vm0, %v326_v38  ;;  %464 = vrcp.f32 %v138_v19  ;;  %v50_v21 = vld [vmem:[%s802_s0 + $0x10] sm:$0xff]  ;;  %v59_v38 = vld [vmem:[%s803_s1 + $0x18] sm:$0xff] }
  0x15   :  { %v463_v25 = vpop.eup %462  ;;  %v292_v29 = vld [vmem:[#allocation3] sm:$0xff]  ;;  %v79_v19 = vld [vmem:[%s805_s3 + $0x38] sm:$0xff] }
  0x16   :  { %v293_v31 = vld [vmem:[#allocation3 + $0x8] sm:$0xff]  ;;  %v324_v33 = vadd.f32 %v429_v30, %v292_v29  ;;  %v295_v39 = vld [vmem:[#allocation3 + $0x18] sm:$0xff]  ;;  %v74_v29 = vld [vmem:[%s805_s3 + $0x10] sm:$0xff] }
  0x17   :  { %206 = vperm.xlu1 %447, %v457_v22   ;;  %v325_v34 = vadd.f32 %v430_v32, %v293_v31  ;;  %v327_v42 = vadd.f32 %v432_v40, %v295_v39  ;;  %v296_v44 = vld [vmem:[#allocation3 + $0x20] sm:$0xff]  ;;  %v297_v47 = vld [vmem:[#allocation3 + $0x28] sm:$0xff]  ;;  %v167_v32 = vshrl.u32 %v166_v20, 7  ;;  %v67_v39 = vld [vmem:[%s804_s2 + $0x18] sm:$0xff] }
  0x18   :  { %201 = vperm.xlu0 %446, %v459_v23   ;;  %332 = vst.msk [vmem:[#allocation3] sm:$0xff] %vm31_vm0, %v324_v33  ;;  %v328_v46 = vadd.f32 %v433_v45, %v296_v44  ;;  %v329_v50 = vadd.f32 %v434_v48, %v297_v47  ;;  %v298_v52 = vld [vmem:[#allocation3 + $0x30] sm:$0xff]  ;;  %v299_v57 = vld [vmem:[#allocation3 + $0x38] sm:$0xff]  ;;  %v48_v22 = vld [vmem:[%s802_s0] sm:$0xff] }
  0x19   :  { %333 = vst.msk [vmem:[#allocation3 + $0x8] sm:$0xff] %vm31_vm0, %v325_v34  ;;  %335 = vst.msk [vmem:[#allocation3 + $0x18] sm:$0xff] %vm31_vm0, %v327_v42  ;;  %v330_v54 = vadd.f32 %v435_v53, %v298_v52  ;;  %v331_v62 = vadd.f32 %v436_v58, %v299_v57  ;;  %v64_v23 = vld [vmem:[%s804_s2] sm:$0xff]  ;;  %v51_v34 = vld [vmem:[%s802_s0 + $0x18] sm:$0xff]  ;;  %v168_v53 = vsub.s32 0, %v167_v32 }
  0x1a   :  { %336 = vst.msk [vmem:[#allocation3 + $0x20] sm:$0xff] %vm31_vm0, %v328_v46  ;;  %337 = vst.msk [vmem:[#allocation3 + $0x28] sm:$0xff] %vm31_vm0, %v329_v50  ;;  %v56_v30 = vld [vmem:[%s803_s1] sm:$0xff]  ;;  %v97_v33 = vsub.f32 %v48_v22, %v64_v23  ;;  %v75_v40 = vld [vmem:[%s805_s3 + $0x18] sm:$0xff] }
  0x1b   :  { %216 = vperm.xlu1 %447, %v461_v24   ;;  %v377_v59 = vld [vmem:[#allocation3 + $0x10] sm:$0xff]  ;;  %338 = vst.msk [vmem:[#allocation3 + $0x30] sm:$0xff] %vm31_vm0, %v330_v54  ;;  %339 = vst.msk [vmem:[#allocation3 + $0x38] sm:$0xff] %vm31_vm0, %v331_v62  ;;  %v72_v31 = vld [vmem:[%s805_s3] sm:$0xff] }
  0x1c   :  { %211 = vperm.xlu0 %446, %v463_v25   ;;  %v386_v0 = vsel %vm31_vm0, %v377_v59, 0.0  ;;  %v58_v24 = vld [vmem:[%s803_s1 + $0x10] sm:$0xff]  ;;  %v105_v42 = vsub.f32 %v56_v30, %v72_v31  ;;  %v49_v44 = vld [vmem:[%s802_s0 + $0x8] sm:$0xff]  ;;  %v113_v54 = vmul.f32 %v97_v33, %v97_v33  ;;  %v52_v57 = vld [vmem:[%s802_s0 + $0x20] sm:$0xff] }
  0x1d   :  { %v66_v25 = vld [vmem:[%s804_s2 + $0x10] sm:$0xff]  ;;  %v107_v36 = vsub.f32 %v58_v24, %v74_v29  ;;  %v57_v45 = vld [vmem:[%s803_s1 + $0x8] sm:$0xff]  ;;  %v60_v62 = vld [vmem:[%s803_s1 + $0x20] sm:$0xff] }
  0x1e   :  { %v99_v35 = vsub.f32 %v50_v21, %v66_v25  ;;  %v65_v46 = vld [vmem:[%s804_s2 + $0x8] sm:$0xff]  ;;  %v465_v47 = vpop.eup %464  ;;  %v54_v20 = vld [vmem:[%s802_s0 + $0x30] sm:$0xff] }
  0x1f   :  { %v375_v55 = vld [vmem:[#allocation3] sm:$0xff]  ;;  %v73_v48 = vld [vmem:[%s805_s3 + $0x8] sm:$0xff]  ;;  %v123_v59 = vmul.f32 %v107_v36, %v107_v36  ;;  %v62_v21 = vld [vmem:[%s803_s1 + $0x30] sm:$0xff] }
  0x20   :  { %v376_v56 = vld [vmem:[#allocation3 + $0x8] sm:$0xff]  ;;  %v383_v60 = vsel %vm31_vm0, %v375_v55, 0.0  ;;  %v378_v1 = vld [vmem:[#allocation3 + $0x18] sm:$0xff]  ;;  %v115_v58 = vmul.f32 %v99_v35, %v99_v35  ;;  %v70_v22 = vld [vmem:[%s804_s2 + $0x30] sm:$0xff] }
  0x21   :  { %v384_v61 = vsel %vm31_vm0, %v376_v56, 0.0  ;;  %v388_v3 = vsel %vm31_vm0, %v378_v1, 0.0  ;;  %v379_v4 = vld [vmem:[#allocation3 + $0x20] sm:$0xff]  ;;  %v380_v7 = vld [vmem:[#allocation3 + $0x28] sm:$0xff]  ;;  %v140_v1 = vmul.f32 0.5, %v465_v47  ;;  %v78_v23 = vld [vmem:[%s805_s3 + $0x30] sm:$0xff] }
  0x22   :  { %v385_v63 = vadd.f32 %v384_v61, %v383_v60  ;;  %v390_v6 = vsel %vm31_vm0, %v379_v4, 0.0  ;;  %v392_v9 = vsel %vm31_vm0, %v380_v7, 0.0  ;;  %v381_v10 = vld [vmem:[#allocation3 + $0x30] sm:$0xff]  ;;  %v382_v13 = vld [vmem:[#allocation3 + $0x38] sm:$0xff]  ;;  %v53_v50 = vld [vmem:[%s802_s0 + $0x28] sm:$0xff]  ;;  %v100_v60 = vsub.f32 %v51_v34, %v67_v39 }
  0x23   :  { %v394_v12 = vsel %vm31_vm0, %v381_v10, 0.0  ;;  %v396_v15 = vsel %vm31_vm0, %v382_v13, 0.0  ;;  %v61_v52 = vld [vmem:[%s803_s1 + $0x28] sm:$0xff]  ;;  %v108_v61 = vsub.f32 %v59_v38, %v75_v40  ;;  %v106_v4 = vsub.f32 %v57_v45, %v73_v48  ;;  %v63_v13 = vld [vmem:[%s803_s1 + $0x38] sm:$0xff] }
  0x24   :  { %v387_v2 = vadd.f32 %v386_v0, %v385_v63  ;;  %v69_v55 = vld [vmem:[%s804_s2 + $0x28] sm:$0xff]  ;;  %v68_v63 = vld [vmem:[%s804_s2 + $0x20] sm:$0xff]  ;;  %v116_v10 = vmul.f32 %v100_v60, %v100_v60  ;;  %v112_v34 = vsub.f32 %v63_v13, %v79_v19  ;;  %v103_v38 = vsub.f32 %v54_v20, %v70_v22 }
  0x25   :  { %v77_v56 = vld [vmem:[%s805_s3 + $0x28] sm:$0xff]  ;;  %v76_v0 = vld [vmem:[%s805_s3 + $0x20] sm:$0xff]  ;;  %v101_v7 = vsub.f32 %v52_v57, %v68_v63  ;;  %v122_v17 = vmul.f32 %v106_v4, %v106_v4  ;;  %v111_v39 = vsub.f32 %v62_v21, %v78_v23 }
  0x26   :  { %v389_v5 = vadd.f32 %v388_v3, %v387_v2  ;;  %v121_v2 = vmul.f32 %v105_v42, %v105_v42  ;;  %v98_v3 = vsub.f32 %v49_v44, %v65_v46 }
  0x27   :  { %v117_v29 = vmul.f32 %v101_v7, %v101_v7 }
  0x28   :  { %v391_v8 = vadd.f32 %v390_v6, %v389_v5  ;;  %v102_v5 = vsub.f32 %v53_v50, %v69_v55  ;;  %v110_v6 = vsub.f32 %v61_v52, %v77_v56  ;;  %v128_v50 = vmul.f32 %v112_v34, %v112_v34 }
  0x29   :  { %v127_v55 = vmul.f32 %v111_v39, %v111_v39 }
  0x2a   :  { %v393_v11 = vadd.f32 %v392_v9, %v391_v8  ;;  %v109_v8 = vsub.f32 %v60_v62, %v76_v0  ;;  %v131_v9 = vadd.f32 %v123_v59, %v115_v58  ;;  %v118_v24 = vmul.f32 %v102_v5, %v102_v5 }
  0x2b   :  { %v126_v25 = vmul.f32 %v110_v6, %v110_v6 }
  0x2c   :  { %v395_v14 = vadd.f32 %v394_v12, %v393_v11  ;;  %v124_v11 = vmul.f32 %v108_v61, %v108_v61  ;;  %v55_v12 = vld [vmem:[%s802_s0 + $0x38] sm:$0xff]  ;;  %v125_v30 = vmul.f32 %v109_v8, %v109_v8 }
  0x2d   :  { %v104_v33 = vsub.f32 %v55_v12, %v71_v18  ;;  %v134_v42 = vadd.f32 %v126_v25, %v118_v24 }
  0x2e   :  { %v397_v16 = vadd.f32 %v396_v15, %v395_v14  ;;  %v169_v14 = vrot.slane %v140_v1, %v168_v53  ;;  %v129_v15 = vadd.f32 %v121_v2, %v113_v54  ;;  %v132_v32 = vadd.f32 %v124_v11, %v116_v10 }
  0x2f   :  { %v133_v44 = vadd.f32 %v125_v30, %v117_v29  ;;  %v120_v48 = vmul.f32 %v104_v33, %v104_v33  ;;  %v119_v54 = vmul.f32 %v103_v38, %v103_v38 }
  0x30   :  { %v173_v31 = vmul.f32 %v169_v14, %v131_v9  ;;  %v171_v35 = vmul.f32 %v169_v14, %v129_v15  ;;  %v174_v47 = vmul.f32 %v169_v14, %v132_v32  ;;  %v176_v62 = vmul.f32 %v169_v14, %v134_v42 }
  0x31   :  { %v136_v63 = vadd.f32 %v128_v50, %v120_v48  ;;  %v175_v2 = vmul.f32 %v169_v14, %v133_v44  ;;  %v268_v48 = vld [vmem:[#allocation2 + $0x8] sm:$0xff] }
  0x33   :  { %v178_v10 = vmul.f32 %v169_v14, %v136_v63  ;;  %v274_v63 = vld [vmem:[#allocation2 + $0x38] sm:$0xff] }
  0x3f   :  { %398 = vadd.xlane.f32.xlu1 %v397_v16  ;;  %v114_v16 = vmul.f32 %v98_v3, %v98_v3  ;;  %v135_v3 = vadd.f32 %v127_v55, %v119_v54  ;;  %v272_v55 = vld [vmem:[#allocation2 + $0x28] sm:$0xff] }
  0x41   :  { %v130_v36 = vadd.f32 %v122_v17, %v114_v16  ;;  %v177_v13 = vmul.f32 %v169_v14, %v135_v3 }
  0x43   :  { %v172_v53 = vmul.f32 %v169_v14, %v130_v36  ;;  %v269_v14 = vld [vmem:[#allocation2 + $0x10] sm:$0xff] }
  0x8e   :  { %v192_v40 = vpop.permute.xlu1 %191 }
  0x8f   :  { %v221_v45 = vmul.f32 %v192_v40, %v173_v31  ;;  %v182_v46 = vpop.permute.xlu0 %181 }
  0x90   :  { %v219_v52 = vmul.f32 %v182_v46, %v171_v35  ;;  %v267_v35 = vld [vmem:[#allocation2] sm:$0xff] }
  0x91   :  { %v229_v56 = vsub.f32 0.0, %v221_v45  ;;  %v270_v45 = vld [vmem:[#allocation2 + $0x18] sm:$0xff] }
  0x92   :  { %v227_v57 = vsub.f32 0.0, %v219_v52  ;;  %v197_v58 = vpop.permute.xlu1 %196 }
  0x93   :  { %v239_v59 = vmul.f32 1.442695, %v229_v56  ;;  %v222_v60 = vmul.f32 %v197_v58, %v174_v47  ;;  %v187_v61 = vpop.permute.xlu0 %186  ;;  %v271_v58 = vld [vmem:[#allocation2 + $0x20] sm:$0xff] }
  0x94   :  { %v235_v0 = vmul.f32 1.442695, %v227_v57  ;;  %v220_v1 = vmul.f32 %v187_v61, %v172_v53 }
  0x95   :  { %466 = vpow2.f32 %v239_v59  ;;  %v230_v4 = vsub.f32 0.0, %v222_v60 }
  0x96   :  { %468 = vpow2.f32 %v235_v0  ;;  %v228_v5 = vsub.f32 0.0, %v220_v1  ;;  %v207_v6 = vpop.permute.xlu1 %206 }
  0x97   :  { %v241_v7 = vmul.f32 1.442695, %v230_v4  ;;  %v224_v8 = vmul.f32 %v207_v6, %v176_v62  ;;  %v202_v9 = vpop.permute.xlu0 %201 }
  0x98   :  { %v237_v11 = vmul.f32 1.442695, %v228_v5  ;;  %v223_v12 = vmul.f32 %v202_v9, %v175_v2  ;;  %v273_v2 = vld [vmem:[#allocation2 + $0x30] sm:$0xff] }
  0x99   :  { %470 = vpow2.f32 %v241_v7  ;;  %v232_v15 = vsub.f32 0.0, %v224_v8 }
  0x9a   :  { %472 = vpow2.f32 %v237_v11  ;;  %v231_v16 = vsub.f32 0.0, %v223_v12  ;;  %v217_v17 = vpop.permute.xlu1 %216 }
  0x9b   :  { %v245_v18 = vmul.f32 1.442695, %v232_v15  ;;  %v226_v19 = vmul.f32 %v217_v17, %v178_v10  ;;  %v212_v20 = vpop.permute.xlu0 %211 }
  0x9c   :  { %v243_v21 = vmul.f32 1.442695, %v231_v16  ;;  %v225_v22 = vmul.f32 %v212_v20, %v177_v13 }
  0x9d   :  { %474 = vpow2.f32 %v245_v18  ;;  %v234_v23 = vsub.f32 0.0, %v226_v19 }
  0x9e   :  { %476 = vpow2.f32 %v243_v21  ;;  %v233_v24 = vsub.f32 0.0, %v225_v22 }
  0x9f   :  { %v467_v25 = vpop.eup %466  ;;  %v249_v29 = vmul.f32 1.442695, %v234_v23 }
  0xa0   :  { %v469_v30 = vpop.eup %468  ;;  %v253_v31 = vsub.f32 1.0, %v467_v25  ;;  %v247_v32 = vmul.f32 1.442695, %v233_v24 }
  0xa1   :  { %v251_v33 = vsub.f32 1.0, %v469_v30  ;;  %478 = vpow2.f32 %v249_v29 }
  0xa2   :  { %v261_v34 = vmul.f32 %v253_v31, %v598_v26  ;;  %480 = vpow2.f32 %v247_v32 }
  0xa3   :  { %v471_v36 = vpop.eup %470  ;;  %v259_v38 = vmul.f32 %v251_v33, %v603_v27 }
  0xa4   :  { %v473_v39 = vpop.eup %472  ;;  %v277_v40 = vadd.f32 %v269_v14, %v261_v34  ;;  %v254_v42 = vsub.f32 1.0, %v471_v36 }
  0xa5   :  { %v275_v44 = vadd.f32 %v267_v35, %v259_v38  ;;  %v252_v46 = vsub.f32 1.0, %v473_v39 }
  0xa6   :  { %286 = vst.msk [vmem:[#allocation2 + $0x10] sm:$0xff] %vm31_vm0, %v277_v40  ;;  %v262_v47 = vmul.f32 %v254_v42, %v619_v37 }
  0xa7   :  { %v475_v50 = vpop.eup %474  ;;  %284 = vst.msk [vmem:[#allocation2] sm:$0xff] %vm31_vm0, %v275_v44  ;;  %v260_v26 = vmul.f32 %v252_v46, %v608_v28 }
  0xa8   :  { %v477_v52 = vpop.eup %476  ;;  %v278_v53 = vadd.f32 %v270_v45, %v262_v47  ;;  %v256_v54 = vsub.f32 1.0, %v475_v50 }
  0xa9   :  { %v276_v27 = vadd.f32 %v268_v48, %v260_v26  ;;  %v255_v56 = vsub.f32 1.0, %v477_v52 }
  0xaa   :  { %287 = vst.msk [vmem:[#allocation2 + $0x18] sm:$0xff] %vm31_vm0, %v278_v53  ;;  %v264_v57 = vmul.f32 %v256_v54, %v635_v43 }
  0xab   :  { %v479_v59 = vpop.eup %478  ;;  %285 = vst.msk [vmem:[#allocation2 + $0x8] sm:$0xff] %vm31_vm0, %v276_v27  ;;  %v263_v37 = vmul.f32 %v255_v56, %v628_v41 }
  0xac   :  { %v481_v60 = vpop.eup %480  ;;  %v280_v61 = vadd.f32 %v272_v55, %v264_v57  ;;  %v258_v62 = vsub.f32 1.0, %v479_v59 }
  0xad   :  { %v279_v28 = vadd.f32 %v271_v58, %v263_v37  ;;  %v257_v0 = vsub.f32 1.0, %v481_v60  ;;  %v345_v6 = vld [vmem:[#allocation2 + $0x10] sm:$0xff] }
  0xae   :  { %289 = vst.msk [vmem:[#allocation2 + $0x28] sm:$0xff] %vm31_vm0, %v280_v61  ;;  %v266_v1 = vmul.f32 %v258_v62, %v651_v51  ;;  %v343_v4 = vld [vmem:[#allocation2] sm:$0xff]  ;;  %v354_v10 = vsel %vm31_vm0, %v345_v6, 0.0 }
  0xaf   :  { %288 = vst.msk [vmem:[#allocation2 + $0x20] sm:$0xff] %vm31_vm0, %v279_v28  ;;  %v265_v43 = vmul.f32 %v257_v0, %v644_v49  ;;  %v351_v7 = vsel %vm31_vm0, %v343_v4, 0.0 }
  0xb0   :  { %v282_v3 = vadd.f32 %v274_v63, %v266_v1 }
  0xb1   :  { %v281_v5 = vadd.f32 %v273_v2, %v265_v43  ;;  %v346_v9 = vld [vmem:[#allocation2 + $0x18] sm:$0xff] }
  0xb2   :  { %291 = vst.msk [vmem:[#allocation2 + $0x38] sm:$0xff] %vm31_vm0, %v282_v3  ;;  %v344_v41 = vld [vmem:[#allocation2 + $0x8] sm:$0xff]  ;;  %v356_v49 = vsel %vm31_vm0, %v346_v9, 0.0 }
  0xb3   :  { %290 = vst.msk [vmem:[#allocation2 + $0x30] sm:$0xff] %vm31_vm0, %v281_v5  ;;  %v352_v8 = vsel %vm31_vm0, %v344_v41, 0.0 }
  0xb4   :  { %v353_v51 = vadd.f32 %v352_v8, %v351_v7 }
  0xb5   :  { %v348_v13 = vld [vmem:[#allocation2 + $0x28] sm:$0xff] }
  0xb6   :  { %v347_v11 = vld [vmem:[#allocation2 + $0x20] sm:$0xff]  ;;  %v355_v12 = vadd.f32 %v354_v10, %v353_v51  ;;  %v360_v19 = vsel %vm31_vm0, %v348_v13, 0.0 }
  0xb7   :  { %v358_v16 = vsel %vm31_vm0, %v347_v11, 0.0 }
  0xb8   :  { %v357_v15 = vadd.f32 %v356_v49, %v355_v12 }
  0xb9   :  { %v350_v20 = vld [vmem:[#allocation2 + $0x38] sm:$0xff] }
  0xba   :  { %v349_v17 = vld [vmem:[#allocation2 + $0x30] sm:$0xff]  ;;  %v359_v18 = vadd.f32 %v358_v16, %v357_v15  ;;  %v364_v24 = vsel %vm31_vm0, %v350_v20, 0.0 }
  0xbb   :  { %v362_v22 = vsel %vm31_vm0, %v349_v17, 0.0 }
  0xbc   :  { %v361_v21 = vadd.f32 %v360_v19, %v359_v18 }
  0xbe   :  { %v363_v23 = vadd.f32 %v362_v22, %v361_v21 }
  0xc0   :  { %v365_v25 = vadd.f32 %v364_v24, %v363_v23 }
  0xc2   :  { %366 = vadd.xlane.f32.xlu0 %v365_v25 }
  0xcc   :  { %v399_v29 = vpop.xlane.xlu1 %398 }
  0xcd   :  { %v400_v30 = vrot.slane %v399_v29, 4 }
  0xcf   :  { %v401_v31 = vadd.f32 %v400_v30, %v399_v29 }
  0xd1   :  { %v402_v32 = vrot.slane %v401_v31, 2 }
  0xd3   :  { %v403_v35 = vadd.f32 %v402_v32, %v401_v31 }
  0xd5   :  { %v404_v39 = vrot.slane %v403_v35, 1 }
  0xd7   :  { %v405_v44 = vadd.f32 %v404_v39, %v403_v35 }
 0x14f   :  { %v367_v14 = vpop.xlane.xlu0 %366 }
 0x150   :  { %v368_v33 = vrot.slane %v367_v14, 4 }
 0x152   :  { %v369_v34 = vadd.f32 %v368_v33, %v367_v14 }
 0x154   :  { %v370_v36 = vrot.slane %v369_v34, 2 }
 0x156   :  { %v371_v38 = vadd.f32 %v370_v36, %v369_v34 }
 0x158   :  { %v372_v40 = vrot.slane %v371_v38, 1 }
 0x15a   :  { %v373_v42 = vadd.f32 %v372_v40, %v371_v38 }
 0x15c   :  { %437 = vpush %v373_v42 }
 0x15d   :  { %439 = vpush %v405_v44 }
 0x18d   :  { %s438_s0 = spop %437 }
 0x18e   :  { %s440_s1 = spop %439 }
 0x18f   :  { %s407_s2 = sadd.f32 1e-09, %s440_s1 }
 0x191   :  { %v408_v45 = vstv %s407_s2 }
 0x192   :  { %482 = vrcp.f32 %v408_v45 }
 0x19c   :  { %v483_v46 = vpop.eup %482 }
 0x19d   :  { %441 = vpush %v483_v46 }
 0x1ce   :  { %s442_s3 = spop %441 }
 0x1cf   :  { %s411_s20 = smul.f32 1088.0, %s442_s3 }
 0x1d1   :  { %s412_s21 = smul.f32 %s438_s0, %s411_s20 }
 0x1d3   :  { %s413_s22 = smul.f32 0.00091911765, %s412_s21 }
 0x1d5   :  { %415 = sst [smem:[#allocation4]] %s413_s22 }
 0x1d6   :  { %493 = shalt.err (!%p490_p2)
}
 0x1d7   :  { %s498_s30 = smov [#allocation4]  }
 0x1d8   :  { %423 = dma.smem_to_hbm %s498_s30, 16, %s809_s7, [#allocation5]  }
 0x1d9   :  { %494 = dma.done.wait [#allocation5], 16  }
 0x1da   :  { %495 = vsyncadd [#allocation5], 4294967280 }
 0x1db   :  { %427 = sfence }
 0x1dc   :  { %428 = vsyncpa [#allocation5], 1 }

</bundles_post_ra>
